<compile_context>
chip_gen: v5e
topology: v5e:2x2
jax: 0.10.0
libtpu: 0.0.40
codegen_flags: <defaults>
</compile_context>

<pallas_src>
import functools

import jax
import jax.numpy as jnp
from jax.experimental import pallas as pl
from jax.experimental.pallas import tpu as pltpu

EPS = 1e-5
NEG_SLOPE = 0.2


def _round_up(x, m):
    return (x + m - 1) // m * m


_BUDGET_CACHE = None


def _budgets():
    """(scoped-VMEM limit, per-call working-set budget), per TPU generation."""
    global _BUDGET_CACHE
    if _BUDGET_CACHE is None:
        try:
            vmem = int(pltpu.get_tpu_info().vmem_capacity_bytes)
        except Exception:
            vmem = 64 * 1024 * 1024          # conservative: v7x per-TC VMEM
        limit = min(vmem * 3 // 4, 100 * 1024 * 1024)
        _BUDGET_CACHE = (limit, limit // 2)
    return _BUDGET_CACHE


def _tn_candidates(ocp):
    """OC tile widths: multiples of 128 that divide ocp, descending."""
    return [d for d in range(ocp, 127, -128) if ocp % d == 0]


def _plan_fused(m_pad, kp, ocp, ib, ob, budget):
    """Pick an OC tile for the fused path; None if the fused path won't fit."""
    cands = _tn_candidates(ocp)
    if ocp >= 256 and len(cands) > 1:
        cands = cands[1:]        # >=2 OC tiles: megacore split + weight-DMA overlap
    for tn in cands:
        ws = (2 * m_pad * kp * ib     # double-buffered (constant-index) patches
              + 2 * kp * tn * ib      # double-buffered weight tile
              + 2 * m_pad * tn * ob   # double-buffered output tile
              + m_pad * tn * 4        # f32 y live inside the kernel
              + 8 * tn * 4)
        if ws <= budget:
            return tn
    return None


def _plan_two_pass(m, kp, ocp, ib, ob, budget):
    """(TM, TN) for the large-M fallback: shrink OC tile first, keep TM MXU-filling."""
    def ws(tm, tn):
        return (2 * tm * kp * ib + 2 * kp * tn * ib
                + 2 * tm * tn * ob + tm * tn * 4 + 4 * tn * 4)
    tm0 = _round_up(min(max(m, 16), 512), 16)      # multiple of 16 (bf16 packing)
    for tn in _tn_candidates(ocp):
        if ws(tm0, tn) <= budget:
            return tm0, tn
    tn = 128
    tm = tm0
    while tm > 16 and ws(tm, tn) > budget:
        tm = _round_up(max(tm // 2, 16), 16)
    return tm, tn


# ---------------------------------------------------------------------------
# Pallas kernels
# ---------------------------------------------------------------------------
def _fused_conv_bn_lrelu_kernel(p_ref, w_ref, g_ref, b_ref, o_ref, *,
                                inv_m, pad_rows):
    """conv (matmul) + exact batch-stat BatchNorm + LeakyReLU, one OC tile."""
    y = jnp.dot(p_ref[...], w_ref[...], preferred_element_type=jnp.float32)
    mean = jnp.sum(y, axis=0, keepdims=True) * inv_m          # (1, TN)
    d = y - mean
    # Zero-padded M rows have y == 0, so each contributes mean^2 to sum(d*d);
    # subtract that exactly (centered variance -> no catastrophic cancellation).
    var = (jnp.sum(d * d, axis=0, keepdims=True)
           - float(pad_rows) * mean * mean) * inv_m
    inv = jax.lax.rsqrt(jnp.maximum(var, 0.0) + EPS)
    scale = g_ref[...] * inv
    shift = b_ref[...] - mean * scale
    yn = y * scale + shift
    o_ref[...] = jnp.where(yn >= 0, yn, NEG_SLOPE * yn).astype(o_ref.dtype)


def _matmul_stats_kernel(p_ref, w_ref, y_ref, st_ref):
    # p_ref: (TM, Kp), w_ref: (Kp, TN); y stored in compute dtype (bf16 path),
    # stats written as one packed (1, 2, TN) f32 block (sum, sum-of-squares).
    y = jnp.dot(p_ref[...], w_ref[...], preferred_element_type=jnp.float32)
    y_ref[...] = y.astype(y_ref.dtype)
    s = jnp.sum(y, axis=0, keepdims=True)
    q = jnp.sum(y * y, axis=0, keepdims=True)
    st_ref[:, 0:1, :] = s[:, None, :]
    st_ref[:, 1:2, :] = q[:, None, :]


def _bn_lrelu_kernel(y_ref, sc_ref, sh_ref, o_ref):
    y = y_ref[...].astype(jnp.float32) * sc_ref[...] + sh_ref[...]
    o_ref[...] = jnp.where(y >= 0, y, NEG_SLOPE * y).astype(o_ref.dtype)


# ---------------------------------------------------------------------------
# Wrapper-side im2col (NHWC, channels-last -> lane axis)
# ---------------------------------------------------------------------------
def _im2col_nhwc(x, c_true, kh, kw, stride, pad, m_pad, kp):
    """x: (N, H, W, C_stored) -> zero-padded patches (m_pad, kp)."""
    n, h, w, _ = x.shape
    xs = x[..., :c_true]                               # drop stored lane padding
    xp = jnp.pad(xs, ((0, 0), (pad, pad), (pad, pad), (0, 0)))
    oh = (h + 2 * pad - kh) // stride + 1
    ow = (w + 2 * pad - kw) // stride + 1
    cols = [xp[:, i:i + stride * oh:stride, j:j + stride * ow:stride, :]
            for i in range(kh) for j in range(kw)]
    k = kh * kw * c_true
    if kp > k:                                          # fold lane pad into concat
        cols.append(jnp.zeros((n, oh, ow, kp - k), x.dtype))
    patches = jnp.concatenate(cols, axis=-1).reshape(n * oh * ow, kp)
    m = n * oh * ow
    if m_pad > m:
        patches = jnp.pad(patches, ((0, m_pad - m), (0, 0)))
    return patches


# ---------------------------------------------------------------------------
# Layer wrappers
# ---------------------------------------------------------------------------
def conv_bn_lrelu_layer(h, c_true, w, gamma, beta, stride, pad,
                        compute_dtype, force_two_pass=False):
    """h: (N, H, W, C_stored) compute_dtype.  Returns (NHWC out, true OC)."""
    oc, ic, kh, kw = w.shape
    assert ic == c_true
    n, hh, ww, _ = h.shape
    oh = (hh + 2 * pad - kh) // stride + 1
    ow = (ww + 2 * pad - kw) // stride + 1
    m = n * oh * ow
    k = kh * kw * ic
    kp = _round_up(k, 128)
    ocp = _round_up(oc, 128)
    ib = jnp.dtype(compute_dtype).itemsize
    ob = ib
    vmem_limit, budget = _budgets()

    # Weight / BN params, lane-padded (padded channels -> gamma=beta=0 -> output 0).
    wmat = jnp.transpose(w, (2, 3, 1, 0)).reshape(k, oc)
    wmat = jnp.pad(wmat, ((0, kp - k), (0, ocp - oc))).astype(compute_dtype)
    gpad = jnp.pad(gamma, (0, ocp - oc)).astype(jnp.float32).reshape(1, ocp)
    bpad = jnp.pad(beta, (0, ocp - oc)).astype(jnp.float32).reshape(1, ocp)

    tn = None if force_two_pass else _plan_fused(
        _round_up(m, 16), kp, ocp, ib, ob, budget)

    # ---- fused path: one pallas_call, no y HBM round-trip --------------------
    if tn is not None:
        m_pad = _round_up(m, 16)
        patches = _im2col_nhwc(h, c_true, kh, kw, stride, pad, m_pad, kp)
        noc = ocp // tn
        out = pl.pallas_call(
            functools.partial(_fused_conv_bn_lrelu_kernel,
                              inv_m=1.0 / float(m), pad_rows=m_pad - m),
            out_shape=jax.ShapeDtypeStruct((m_pad, ocp), compute_dtype),
            grid=(noc,),
            in_specs=[
                pl.BlockSpec((m_pad, kp), lambda j: (0, 0)),
                pl.BlockSpec((kp, tn), lambda j: (0, j)),
                pl.BlockSpec((1, tn), lambda j: (0, j)),
                pl.BlockSpec((1, tn), lambda j: (0, j)),
            ],
            out_specs=pl.BlockSpec((m_pad, tn), lambda j: (0, j)),
            compiler_params=pltpu.CompilerParams(
                dimension_semantics=("parallel",),
                vmem_limit_bytes=vmem_limit),
            cost_estimate=pl.CostEstimate(
                flops=2 * m_pad * kp * ocp,
                transcendentals=2 * ocp,
                bytes_accessed=(m_pad * kp + kp * ocp) * ib + m_pad * ocp * ob),
        )(patches, wmat, gpad, bpad)
        return out[:m].reshape(n, oh, ow, ocp), oc

    # ---- two-pass fallback (large M) -----------------------------------------
    tm, tn = _plan_two_pass(m, kp, ocp, ib, ob, budget)
    m_pad = _round_up(m, tm)
    mt = m_pad // tm
    noc = ocp // tn
    patches = _im2col_nhwc(h, c_true, kh, kw, stride, pad, m_pad, kp)

    # pass 1: (OC, M)-tiled matmul; y in compute dtype + packed per-tile stats.
    y, stats = pl.pallas_call(
        _matmul_stats_kernel,
        out_shape=(
            jax.ShapeDtypeStruct((m_pad, ocp), compute_dtype),
            jax.ShapeDtypeStruct((mt, 2, ocp), jnp.float32),
        ),
        grid=(noc, mt),
        in_specs=[
            pl.BlockSpec((tm, kp), lambda j, i: (i, 0)),
            pl.BlockSpec((kp, tn), lambda j, i: (0, j)),
        ],
        out_specs=(
            pl.BlockSpec((tm, tn), lambda j, i: (i, j)),
            pl.BlockSpec((1, 2, tn), lambda j, i: (i, 0, j)),
        ),
        compiler_params=pltpu.CompilerParams(
            dimension_semantics=("parallel", "parallel"),
            vmem_limit_bytes=vmem_limit),
        cost_estimate=pl.CostEstimate(
            flops=2 * m_pad * kp * ocp,
            transcendentals=0,
            bytes_accessed=(noc * m_pad * kp + kp * ocp) * ib
                           + m_pad * ocp * ob + mt * 2 * ocp * 4),
    )(patches, wmat)

    # Exact biased batch statistics over the true M rows (zero pad rows are neutral).
    s = jnp.sum(stats[:, 0, :], axis=0)
    q = jnp.sum(stats[:, 1, :], axis=0)
    mean = s / float(m)
    # NOTE: single-pass E[y^2]-E[y]^2 in f32; clamp keeps it safe at DCGAN scale.
    var = jnp.maximum(q / float(m) - mean * mean, 0.0)
    inv = jax.lax.rsqrt(var + EPS)
    scale = (gpad[0] * inv).reshape(1, ocp).astype(jnp.float32)
    shift = (bpad[0] - mean * gpad[0] * inv).reshape(1, ocp).astype(jnp.float32)

    # pass 2: tiled normalize + affine + LeakyReLU (lane-dense store).
    out = pl.pallas_call(
        _bn_lrelu_kernel,
        out_shape=jax.ShapeDtypeStruct((m_pad, ocp), compute_dtype),
        grid=(mt,),
        in_specs=[
            pl.BlockSpec((tm, ocp), lambda i: (i, 0)),
            pl.BlockSpec((1, ocp), lambda i: (0, 0)),
            pl.BlockSpec((1, ocp), lambda i: (0, 0)),
        ],
        out_specs=pl.BlockSpec((tm, ocp), lambda i: (i, 0)),
        compiler_params=pltpu.CompilerParams(
            dimension_semantics=("parallel",),
            vmem_limit_bytes=vmem_limit),
        cost_estimate=pl.CostEstimate(
            flops=4 * m_pad * ocp, transcendentals=0,
            bytes_accessed=m_pad * ocp * 2 * ob + 2 * ocp * 4),
    )(y, scale, shift)

    return out[:m].reshape(n, oh, ow, ocp), oc


def final_layer(h, c_true, w, compute_dtype):
    """Final 4x4 valid conv (OC=1) + batch-mean as a VPU multiply-and-reduce."""
    n, hh, ww, cpad = h.shape
    oc, ic, kh, kw = w.shape
    assert oc == 1 and hh == kh and ww == kw and ic == c_true
    kf = kh * kw * cpad

    x_flat = h.reshape(n, kf)                              # (h, w, c) order
    wmat = jnp.transpose(w, (2, 3, 1, 0))                  # (KH, KW, IC, 1)
    wmat = jnp.pad(wmat, ((0, 0), (0, 0), (0, cpad - ic), (0, 0)))
    wrow = wmat.reshape(1, kf).astype(jnp.float32)
    inv_n = 1.0 / float(n)
    vmem_limit, _ = _budgets()

    def final_kernel(x_ref, w_ref, o_ref):
        prod = x_ref[...].astype(jnp.float32) * w_ref[...]
        o_ref[...] = jnp.sum(prod, axis=(0, 1), keepdims=True) * inv_n

    out = pl.pallas_call(
        final_kernel,
        out_shape=jax.ShapeDtypeStruct((1, 1), jnp.float32),
        grid=(1,),
        in_specs=[
            pl.BlockSpec((n, kf), lambda i: (0, 0)),
            pl.BlockSpec((1, kf), lambda i: (0, 0)),
        ],
        out_specs=pl.BlockSpec((1, 1), lambda i: (0, 0)),
        compiler_params=pltpu.CompilerParams(
            dimension_semantics=("arbitrary",),
            vmem_limit_bytes=vmem_limit),
    )(x_flat, wrow)
    return out.reshape(1)                                  # output.mean(0).view(1)


# ---------------------------------------------------------------------------
# Parameter construction (deterministic) + forward
# ---------------------------------------------------------------------------
def init_dcgan_d_params(key, isize, nc, ndf, n_extra_layers=0):
    assert isize % 16 == 0, "isize has to be a multiple of 16"
    specs = [(nc, ndf, 4, 2, 1)]          # initial block
    csize, cndf = isize // 2, ndf
    for _ in range(n_extra_layers):       # extra blocks
        specs.append((cndf, cndf, 3, 1, 1))
    while csize > 4:                      # pyramid blocks
        specs.append((cndf, cndf * 2, 4, 2, 1))
        cndf *= 2
        csize //= 2
    blocks = []
    for (inf, of, k, s, p) in specs:
        key, k1, k2, k3 = jax.random.split(key, 4)
        blocks.append({
            "w": 0.02 * jax.random.normal(k1, (of, inf, k, k), jnp.float32),
            "g": 1.0 + 0.02 * jax.random.normal(k2, (of,), jnp.float32),
            "b": 0.02 * jax.random.normal(k3, (of,), jnp.float32),
            "stride": s, "pad": p,
        })
    key, kf = jax.random.split(key)
    final_w = 0.02 * jax.random.normal(kf, (1, cndf, 4, 4), jnp.float32)
    return {"blocks": blocks, "final_w": final_w}


def dcgan_d_forward(x_nchw, params, compute_dtype=jnp.bfloat16,
                    force_two_pass=False):
    # TODO(synk): nn.parallel.data_parallel multi-GPU dispatch is a no-op here
    # (single-device forward); semantics are identical for ngpu <= 1.
    h = jnp.transpose(x_nchw, (0, 2, 3, 1)).astype(compute_dtype)  # NCHW->NHWC once
    c_true = x_nchw.shape[1]
    for blk in params["blocks"]:
        h, c_true = conv_bn_lrelu_layer(h, c_true, blk["w"], blk["g"], blk["b"],
                                        blk["stride"], blk["pad"], compute_dtype,
                                        force_two_pass=force_two_pass)
    return final_layer(h, c_true, params["final_w"], compute_dtype)


# ---------------------------------------------------------------------------
# Pure-JAX reference (for correctness check)
# ---------------------------------------------------------------------------
def ref_forward(x, params):
    def conv(x, w, s, p):
        return jax.lax.conv_general_dilated(
            x, w, (s, s), [(p, p), (p, p)],
            dimension_numbers=("NCHW", "OIHW", "NCHW"),
            precision=jax.lax.Precision.HIGHEST)

    y = x
    for blk in params["blocks"]:
        y = conv(y, blk["w"], blk["stride"], blk["pad"])
        mean = jnp.mean(y, axis=(0, 2, 3), keepdims=True)
        var = jnp.mean(jnp.square(y - mean), axis=(0, 2, 3), keepdims=True)
        y = (y - mean) * jax.lax.rsqrt(var + EPS)
        y = y * blk["g"].reshape(1, -1, 1, 1) + blk["b"].reshape(1, -1, 1, 1)
        y = jnp.where(y >= 0, y, NEG_SLOPE * y)
    y = conv(y, params["final_w"], 1, 0)       # (N, 1, 1, 1)
    return jnp.mean(y, axis=0).reshape(1)


if __name__ == "__main__":
    key = jax.random.PRNGKey(0)
    kx, kparam = jax.random.split(key)
    isize, nc, ndf, batch = 16, 4, 8, 2
    x = jax.random.normal(kx, (batch, nc, isize, isize), jnp.float32)
    params = init_dcgan_d_params(kparam, isize, nc, ndf, n_extra_layers=0)

    ref = jax.block_until_ready(ref_forward(x, params))

    # f32 compute path, fused single-call-per-layer structure.
    out_f32 = jax.block_until_ready(dcgan_d_forward(x, params, jnp.float32))
    assert out_f32.shape == (1,), out_f32.shape
    assert jnp.allclose(out_f32, ref, atol=1e-2, rtol=1e-2), (out_f32, ref)

    # Exercise + check the large-M two-pass fallback path as well.
    out_tp = jax.block_until_ready(
        dcgan_d_forward(x, params, jnp.float32, force_two_pass=True))
    assert out_tp.shape == (1,), out_tp.shape
    assert jnp.allclose(out_tp, ref, atol=1e-2, rtol=1e-2), (out_tp, ref)

    # bf16 compute path (default / performance path): looser tolerance.
    out_bf16 = jax.block_until_ready(dcgan_d_forward(x, params, jnp.bfloat16))
    assert out_bf16.shape == (1,), out_bf16.shape
    assert jnp.allclose(out_bf16, ref, atol=5e-2, rtol=5e-2), (out_bf16, ref)

    print("KERNEL_OK")
</pallas_src>

<mosaic_0001>
module attributes {stable_mosaic.version = 11 : i64} {
  func.func @_fused_conv_bn_lrelu_kernel(%arg0: i32, %arg1: memref<128x128xf32, #tpu.memory_space<vmem>>, %arg2: memref<128x128xf32, #tpu.memory_space<vmem>>, %arg3: memref<1x128xf32, #tpu.memory_space<vmem>>, %arg4: memref<1x128xf32, #tpu.memory_space<vmem>>, %arg5: memref<128x128xf32, #tpu.memory_space<vmem>>) attributes {dimension_semantics = [#tpu.dimension_semantics<parallel>], iteration_bounds = array<i64: 1>, scalar_prefetch = 0 : i64, scratch_operands = 0 : i64, tpu.core_type = #tpu.core_type<tc>, window_params = [{pipeline_mode = #tpu.pipeline_mode<synchronous>, transform_indices = @transform_0, window_bounds = array<i64: 128, 128>}, {transform_indices = @transform_1, window_bounds = array<i64: 128, 128>}, {transform_indices = @transform_2, window_bounds = array<i64: 1, 128>}, {transform_indices = @transform_3, window_bounds = array<i64: 1, 128>}, {transform_indices = @transform_4, window_bounds = array<i64: 128, 128>}]} {
    %c0 = arith.constant 0 : index
    %c0_0 = arith.constant 0 : index
    %0 = vector.load %arg1[%c0, %c0_0] : memref<128x128xf32, #tpu.memory_space<vmem>>, vector<128x128xf32>
    %c0_1 = arith.constant 0 : index
    %c0_2 = arith.constant 0 : index
    %1 = vector.load %arg2[%c0_1, %c0_2] : memref<128x128xf32, #tpu.memory_space<vmem>>, vector<128x128xf32>
    %cst = arith.constant dense<0.000000e+00> : vector<128x128xf32>
    %2 = tpu.matmul %0, %1, %cst {dimension_numbers = #tpu.dot_dimension_numbers<[1], [0], [0], [1], [0, 0, 1, 1], [], []>} : vector<128x128xf32>, vector<128x128xf32>, vector<128x128xf32> -> vector<128x128xf32>
    %cst_3 = arith.constant dense<0.000000e+00> : vector<128xf32>
    %3 = vector.multi_reduction <add>, %2, %cst_3 [0] : vector<128x128xf32> to vector<128xf32>
    %4 = vector.shape_cast %3 : vector<128xf32> to vector<1x128xf32>
    %cst_4 = arith.constant 7.812500e-03 : f32
    %5 = vector.broadcast %cst_4 : f32 to vector<1x128xf32>
    %6 = arith.mulf %4, %5 : vector<1x128xf32>
    %7 = vector.broadcast %6 : vector<1x128xf32> to vector<128x128xf32>
    %8 = arith.subf %2, %7 : vector<128x128xf32>
    %9 = arith.mulf %8, %8 : vector<128x128xf32>
    %cst_5 = arith.constant dense<0.000000e+00> : vector<128xf32>
    %10 = vector.multi_reduction <add>, %9, %cst_5 [0] : vector<128x128xf32> to vector<128xf32>
    %11 = vector.shape_cast %10 : vector<128xf32> to vector<1x128xf32>
    %cst_6 = arith.constant 0.000000e+00 : f32
    %12 = vector.broadcast %cst_6 : f32 to vector<1x128xf32>
    %13 = arith.mulf %12, %6 : vector<1x128xf32>
    %14 = arith.mulf %13, %6 : vector<1x128xf32>
    %15 = arith.subf %11, %14 : vector<1x128xf32>
    %cst_7 = arith.constant 7.812500e-03 : f32
    %16 = vector.broadcast %cst_7 : f32 to vector<1x128xf32>
    %17 = arith.mulf %15, %16 : vector<1x128xf32>
    %cst_8 = arith.constant 0.000000e+00 : f32
    %18 = vector.broadcast %cst_8 : f32 to vector<1x128xf32>
    %19 = arith.maximumf %17, %18 : vector<1x128xf32>
    %cst_9 = arith.constant 9.99999974E-6 : f32
    %20 = vector.broadcast %cst_9 : f32 to vector<1x128xf32>
    %21 = arith.addf %19, %20 : vector<1x128xf32>
    %22 = math.rsqrt %21 : vector<1x128xf32>
    %c0_10 = arith.constant 0 : index
    %c0_11 = arith.constant 0 : index
    %23 = vector.load %arg3[%c0_10, %c0_11] : memref<1x128xf32, #tpu.memory_space<vmem>>, vector<1x128xf32>
    %24 = arith.mulf %23, %22 : vector<1x128xf32>
    %c0_12 = arith.constant 0 : index
    %c0_13 = arith.constant 0 : index
    %25 = vector.load %arg4[%c0_12, %c0_13] : memref<1x128xf32, #tpu.memory_space<vmem>>, vector<1x128xf32>
    %26 = arith.mulf %6, %24 : vector<1x128xf32>
    %27 = arith.subf %25, %26 : vector<1x128xf32>
    %28 = vector.broadcast %24 : vector<1x128xf32> to vector<128x128xf32>
    %29 = arith.mulf %2, %28 : vector<128x128xf32>
    %30 = vector.broadcast %27 : vector<1x128xf32> to vector<128x128xf32>
    %31 = arith.addf %29, %30 : vector<128x128xf32>
    %cst_14 = arith.constant 0.000000e+00 : f32
    %32 = vector.broadcast %cst_14 : f32 to vector<128x128xf32>
    %33 = arith.cmpf oge, %31, %32 : vector<128x128xf32>
    %cst_15 = arith.constant 2.000000e-01 : f32
    %34 = vector.broadcast %cst_15 : f32 to vector<128x128xf32>
    %35 = arith.mulf %34, %31 : vector<128x128xf32>
    %36 = arith.select %33, %31, %35 : vector<128x128xi1>, vector<128x128xf32>
    %c0_16 = arith.constant 0 : index
    %c0_17 = arith.constant 0 : index
    %37 = vector.load %arg5[%c0_16, %c0_17] : memref<128x128xf32, #tpu.memory_space<vmem>>, vector<128x128xf32>
    tpu.vector_store %arg5[%c0_16, %c0_17], %36 {strides = array<i32>} : memref<128x128xf32, #tpu.memory_space<vmem>>, vector<128x128xf32>,
    return
  }
  func.func @transform_0(%arg0: i32) -> (i32, i32) {
    %c0_i32 = arith.constant 0 : i32
    %c0_i32_0 = arith.constant 0 : i32
    %c0_i32_1 = arith.constant 0 : i32
    return %c0_i32, %c0_i32_0 : i32, i32
  }
  func.func @transform_1(%arg0: i32) -> (i32, i32) {
    %c0_i32 = arith.constant 0 : i32
    %c0_i32_0 = arith.constant 0 : i32
    return %c0_i32, %arg0 : i32, i32
  }
  func.func @transform_2(%arg0: i32) -> (i32, i32) {
    %c0_i32 = arith.constant 0 : i32
    %c0_i32_0 = arith.constant 0 : i32
    return %c0_i32, %arg0 : i32, i32
  }
  func.func @transform_3(%arg0: i32) -> (i32, i32) {
    %c0_i32 = arith.constant 0 : i32
    %c0_i32_0 = arith.constant 0 : i32
    return %c0_i32, %arg0 : i32, i32
  }
  func.func @transform_4(%arg0: i32) -> (i32, i32) {
    %c0_i32 = arith.constant 0 : i32
    %c0_i32_0 = arith.constant 0 : i32
    return %c0_i32, %arg0 : i32, i32
  }
}

</mosaic_0001>

<bundles_post_ra>
// kernel: tpu_custom_call.1
= control target key start
LH: loop header
LB: loop body
LE: loop exit
PB: predicated region body
PF: predicated region fallthrough
CT: control target
= control target key end

     0   :  { %9 = vsyncpa [#allocation3], 0  ;;  %s675_s0 = inlined_call_operand.hbm [shape: f32[128,128], index: 0, kind: input, shape index: {}]   ;;  %s676_s1 = inlined_call_operand.hbm [shape: f32[128,128], index: 1, kind: input, shape index: {}]   ;;  %s677_s2 = inlined_call_operand.vmem [shape: f32[1,128], index: 2, kind: input, shape index: {}]   ;;  %s678_s3 = inlined_call_operand.vmem [shape: f32[1,128], index: 3, kind: input, shape index: {}]   ;;  %s679_s4 = inlined_call_operand.hbm [shape: f32[128,128], index: 4, kind: output, shape index: {}]  }
   0x1   :  { %10 = vsyncpa [#allocation6], 0 }
   0x2   :  { %11 = vsyncpa [#allocation4], 0  ;;  %s16_s17 = sshll.u32 %s675_s0, 4  ;;  %s498_s18 = smov [#allocation2]   ;;  %s17_s17 = int_to_ptr.hbm [resolvable:$true] %s16_s17 }
   0x3   :  { %s18_s19 = sshll.u32 %s498_s18, 4  ;;  %s29_s22 = sshll.u32 %s676_s1, 4  ;;  %s19_s19 = int_to_ptr.vmem [resolvable:$true] %s18_s19  ;;  %s30_s22 = int_to_ptr.hbm [resolvable:$true] %s29_s22 }
   0x4   :  { %s499_s23 = smov 128   ;;  %s500_s24 = smov 8  }
   0x5   :  { %24 = dma.hbm_to_vmem [thread:$0]  %s17_s17, 2048, %s19_s19, [#allocation3], %s499_s23, %s499_s23, %s500_s24  }
   0x6   :  { %s501_s25 = smov [#allocation5]  }
   0x7   :  { %s31_s26 = sshll.u32 %s501_s25, 4  ;;  %s32_s26 = int_to_ptr.vmem [resolvable:$true] %s31_s26 }
   0x8   :  { %37 = dma.hbm_to_vmem [thread:$0]  %s30_s22, 2048, %s32_s26, [#allocation6], %s499_s23, %s499_s23, %s500_s24  }
   0x9   :  { %492 = dma.done.wait [#allocation3], 2048  }
   0xa   :  { %493 = vsyncadd [#allocation3], 4294965248 }
   0xb   :  { %494 = dma.done.wait [#allocation6], 2048  }
   0xc   :  { %495 = vsyncadd [#allocation6], 4294965248  ;;  %v81_v0 = vld [vmem:[#allocation5 + $0x78] sm:$0xff]  ;;  %v80_v1 = vld [vmem:[#allocation5 + $0x70] sm:$0xff]  ;;  %s351_s5 = sshll.u32 %s679_s4, 4  ;;  %s352_s5 = int_to_ptr.hbm [resolvable:$true] %s351_s5 }
   0xd   :  { %82 = vmatpush.msra.mxu0 %v81_v0  ;;  %365 = vmatpush.msra.mxu1 %v81_v0  ;;  %v79_v2 = vld [vmem:[#allocation5 + $0x68] sm:$0xff]  ;;  %v78_v3 = vld [vmem:[#allocation5 + $0x60] sm:$0xff]  ;;  %v77_v4 = vld [vmem:[#allocation5 + $0x58] sm:$0xff] }
   0xe   :  { %366 = vmatpush.msra.mxu2 %v81_v0  ;;  %367 = vmatpush.msra.mxu3 %v81_v0  ;;  %v76_v5 = vld [vmem:[#allocation5 + $0x50] sm:$0xff]  ;;  %v75_v6 = vld [vmem:[#allocation5 + $0x48] sm:$0xff]  ;;  %v74_v7 = vld [vmem:[#allocation5 + $0x40] sm:$0xff] }
   0xf   :  { %83 = vmatpush.msra.mxu0 %v80_v1  ;;  %368 = vmatpush.msra.mxu1 %v80_v1  ;;  %v73_v8 = vld [vmem:[#allocation5 + $0x38] sm:$0xff]  ;;  %v72_v9 = vld [vmem:[#allocation5 + $0x30] sm:$0xff]  ;;  %v71_v10 = vld [vmem:[#allocation5 + $0x28] sm:$0xff] }
  0x10   :  { %369 = vmatpush.msra.mxu2 %v80_v1  ;;  %370 = vmatpush.msra.mxu3 %v80_v1  ;;  %v70_v11 = vld [vmem:[#allocation5 + $0x20] sm:$0xff]  ;;  %v69_v12 = vld [vmem:[#allocation5 + $0x18] sm:$0xff]  ;;  %v68_v13 = vld [vmem:[#allocation5 + $0x10] sm:$0xff] }
  0x11   :  { %84 = vmatpush.msra.mxu0 %v79_v2  ;;  %371 = vmatpush.msra.mxu1 %v79_v2  ;;  %v67_v14 = vld [vmem:[#allocation5 + $0x8] sm:$0xff]  ;;  %v66_v15 = vld [vmem:[#allocation5] sm:$0xff]  ;;  %v52_v24 = vld [vmem:[#allocation2 + $0x10] sm:$0xff] }
  0x12   :  { %372 = vmatpush.msra.mxu2 %v79_v2  ;;  %373 = vmatpush.msra.mxu3 %v79_v2  ;;  %v50_v16 = vld [vmem:[#allocation2] sm:$0xff]  ;;  %v51_v20 = vld [vmem:[#allocation2 + $0x8] sm:$0xff]  ;;  %v56_v25 = vld [vmem:[#allocation2 + $0x30] sm:$0xff] }
  0x13   :  { %85 = vmatpush.msra.mxu0 %v78_v3  ;;  %374 = vmatpush.msra.mxu1 %v78_v3  ;;  %v54_v17 = vld [vmem:[#allocation2 + $0x20] sm:$0xff]  ;;  %v55_v21 = vld [vmem:[#allocation2 + $0x28] sm:$0xff]  ;;  %v60_v26 = vld [vmem:[#allocation2 + $0x50] sm:$0xff] }
  0x14   :  { %375 = vmatpush.msra.mxu2 %v78_v3  ;;  %376 = vmatpush.msra.mxu3 %v78_v3  ;;  %v58_v18 = vld [vmem:[#allocation2 + $0x40] sm:$0xff]  ;;  %v59_v22 = vld [vmem:[#allocation2 + $0x48] sm:$0xff]  ;;  %v64_v27 = vld [vmem:[#allocation2 + $0x70] sm:$0xff] }
  0x15   :  { %86 = vmatpush.msra.mxu0 %v77_v4  ;;  %377 = vmatpush.msra.mxu1 %v77_v4  ;;  %v62_v19 = vld [vmem:[#allocation2 + $0x60] sm:$0xff]  ;;  %v63_v23 = vld [vmem:[#allocation2 + $0x68] sm:$0xff]  ;;  %v53_v28 = vld [vmem:[#allocation2 + $0x18] sm:$0xff] }
  0x16   :  { %378 = vmatpush.msra.mxu2 %v77_v4  ;;  %379 = vmatpush.msra.mxu3 %v77_v4  ;;  %v57_v29 = vld [vmem:[#allocation2 + $0x38] sm:$0xff] }
  0x17   :  { %87 = vmatpush.msra.mxu0 %v76_v5  ;;  %380 = vmatpush.msra.mxu1 %v76_v5  ;;  %v61_v30 = vld [vmem:[#allocation2 + $0x58] sm:$0xff] }
  0x18   :  { %381 = vmatpush.msra.mxu2 %v76_v5  ;;  %382 = vmatpush.msra.mxu3 %v76_v5  ;;  %v65_v31 = vld [vmem:[#allocation2 + $0x78] sm:$0xff] }
  0x19   :  { %88 = vmatpush.msra.mxu0 %v75_v6  ;;  %383 = vmatpush.msra.mxu1 %v75_v6 }
  0x1a   :  { %384 = vmatpush.msra.mxu2 %v75_v6  ;;  %385 = vmatpush.msra.mxu3 %v75_v6 }
  0x1b   :  { %89 = vmatpush.msra.mxu0 %v74_v7  ;;  %386 = vmatpush.msra.mxu1 %v74_v7 }
  0x1c   :  { %387 = vmatpush.msra.mxu2 %v74_v7  ;;  %388 = vmatpush.msra.mxu3 %v74_v7 }
  0x1d   :  { %90 = vmatpush.msra.mxu0 %v73_v8  ;;  %389 = vmatpush.msra.mxu1 %v73_v8 }
  0x1e   :  { %390 = vmatpush.msra.mxu2 %v73_v8  ;;  %391 = vmatpush.msra.mxu3 %v73_v8 }
  0x1f   :  { %91 = vmatpush.msra.mxu0 %v72_v9  ;;  %392 = vmatpush.msra.mxu1 %v72_v9 }
  0x20   :  { %393 = vmatpush.msra.mxu2 %v72_v9  ;;  %394 = vmatpush.msra.mxu3 %v72_v9 }
  0x21   :  { %92 = vmatpush.msra.mxu0 %v71_v10  ;;  %395 = vmatpush.msra.mxu1 %v71_v10 }
  0x22   :  { %396 = vmatpush.msra.mxu2 %v71_v10  ;;  %397 = vmatpush.msra.mxu3 %v71_v10 }
  0x23   :  { %93 = vmatpush.msra.mxu0 %v70_v11  ;;  %398 = vmatpush.msra.mxu1 %v70_v11 }
  0x24   :  { %399 = vmatpush.msra.mxu2 %v70_v11  ;;  %400 = vmatpush.msra.mxu3 %v70_v11 }
  0x25   :  { %94 = vmatpush.msra.mxu0 %v69_v12  ;;  %401 = vmatpush.msra.mxu1 %v69_v12 }
  0x26   :  { %402 = vmatpush.msra.mxu2 %v69_v12  ;;  %403 = vmatpush.msra.mxu3 %v69_v12 }
  0x27   :  { %95 = vmatpush.msra.mxu0 %v68_v13  ;;  %404 = vmatpush.msra.mxu1 %v68_v13 }
  0x28   :  { %405 = vmatpush.msra.mxu2 %v68_v13  ;;  %406 = vmatpush.msra.mxu3 %v68_v13 }
  0x29   :  { %96 = vmatpush.msra.mxu0 %v67_v14  ;;  %407 = vmatpush.msra.mxu1 %v67_v14 }
  0x2a   :  { %408 = vmatpush.msra.mxu2 %v67_v14  ;;  %409 = vmatpush.msra.mxu3 %v67_v14 }
  0x2b   :  { %97 = vmatpush.msra.mxu0 %v66_v15  ;;  %410 = vmatpush.msra.mxu1 %v66_v15 }
  0x2c   :  { %98 = vmatmul.f32.vlgmr.msra.gmra.mxu0 %v50_v16  ;;  %110 = vmatmul.f32.vlgmr.msra.gmra.mxu1 %v54_v17 }
  0x2d   :  { %411 = vmatpush.msra.mxu2 %v66_v15  ;;  %412 = vmatpush.msra.mxu3 %v66_v15 }
  0x2e   :  { %122 = vmatmul.f32.vlgmr.msra.gmra.mxu2 %v58_v18  ;;  %134 = vmatmul.f32.vlgmr.msra.gmra.mxu3 %v62_v19 }
  0x34   :  { %101 = vmatmul.f32.gmra.mxu0 %v51_v20  ;;  %113 = vmatmul.f32.gmra.mxu1 %v55_v21 }
  0x36   :  { %125 = vmatmul.f32.gmra.mxu2 %v59_v22  ;;  %137 = vmatmul.f32.gmra.mxu3 %v63_v23 }
  0x3c   :  { %104 = vmatmul.f32.gmra.mxu0 %v52_v24  ;;  %116 = vmatmul.f32.gmra.mxu1 %v56_v25 }
  0x3e   :  { %128 = vmatmul.f32.gmra.mxu2 %v60_v26  ;;  %140 = vmatmul.f32.gmra.mxu3 %v64_v27 }
  0x44   :  { %107 = vmatmul.f32.gmra.mxu0 %v53_v28  ;;  %119 = vmatmul.f32.gmra.mxu1 %v57_v29 }
  0x46   :  { %131 = vmatmul.f32.gmra.mxu2 %v61_v30  ;;  %143 = vmatmul.f32.gmra.mxu3 %v65_v31 }
  0xa9   :  { %v540_v32 = vpop.f32.mrf.mxu0  ;;  %v542_v33 = vpop.f32.mrf.mxu1 }
  0xb1   :  { %v544_v34 = vpop.f32.mrf.mxu0  ;;  %v546_v35 = vpop.f32.mrf.mxu2 }
  0xb2   :  { %v548_v36 = vpop.f32.mrf.mxu1  ;;  %v552_v38 = vpop.f32.mrf.mxu3  ;;  %v147_v41 = vadd.f32 %v544_v34, %v540_v32 }
  0xb9   :  { %v550_v37 = vpop.f32.mrf.mxu0  ;;  %v554_v39 = vpop.f32.mrf.mxu2 }
  0xba   :  { %v556_v40 = vpop.f32.mrf.mxu1  ;;  %v148_v42 = vadd.f32 %v147_v41, %v550_v37  ;;  %v564_v45 = vpop.f32.mrf.mxu3 }
  0xc1   :  { %v561_v43 = vpop.f32.mrf.mxu0  ;;  %v567_v47 = vpop.f32.mrf.mxu2 }
  0xc2   :  { %v149_v44 = vadd.f32 %v148_v42, %v561_v43  ;;  %v570_v49 = vpop.f32.mrf.mxu1  ;;  %v575_v53 = vpop.f32.mrf.mxu3 }
  0xc4   :  { %v150_v46 = vadd.f32 %v149_v44, %v542_v33 }
  0xc6   :  { %v151_v48 = vadd.f32 %v150_v46, %v548_v36 }
  0xc8   :  { %v152_v50 = vadd.f32 %v151_v48, %v556_v40 }
  0xc9   :  { %v578_v55 = vpop.f32.mrf.mxu2 }
  0xca   :  { %v153_v51 = vadd.f32 %v152_v50, %v570_v49  ;;  %v584_v60 = vpop.f32.mrf.mxu3 }
  0xcc   :  { %v154_v52 = vadd.f32 %v153_v51, %v546_v35 }
  0xce   :  { %v155_v54 = vadd.f32 %v154_v52, %v554_v39 }
  0xd0   :  { %v156_v56 = vadd.f32 %v155_v54, %v567_v47 }
  0xd2   :  { %v157_v57 = vadd.f32 %v156_v56, %v578_v55 }
  0xd4   :  { %v158_v58 = vadd.f32 %v157_v57, %v552_v38 }
  0xd6   :  { %v159_v59 = vadd.f32 %v158_v58, %v564_v45 }
  0xd8   :  { %v160_v61 = vadd.f32 %v159_v59, %v575_v53 }
  0xda   :  { %v161_v62 = vadd.f32 %v160_v61, %v584_v60 }
  0xdc   :  { %v162_v63 = vrot.slane %v161_v62, 4 }
  0xde   :  { %v163_v0 = vadd.f32 %v162_v63, %v161_v62 }
  0xe0   :  { %v164_v1 = vrot.slane %v163_v0, 2 }
  0xe2   :  { %v165_v2 = vadd.f32 %v164_v1, %v163_v0 }
  0xe4   :  { %v166_v3 = vrot.slane %v165_v2, 1 }
  0xe6   :  { %v167_v4 = vadd.f32 %v166_v3, %v165_v2 }
  0xe8   :  { %v588_v5 = vmul.f32 0.0078125, %v167_v4 }
  0xea   :  { %v169_v6 = vsub.f32 %v540_v32, %v588_v5  ;;  %v170_v7 = vsub.f32 %v544_v34, %v588_v5  ;;  %v171_v8 = vsub.f32 %v550_v37, %v588_v5  ;;  %v172_v11 = vsub.f32 %v561_v43, %v588_v5 }
  0xeb   :  { %v173_v12 = vsub.f32 %v542_v33, %v588_v5  ;;  %v174_v15 = vsub.f32 %v548_v36, %v588_v5  ;;  %v175_v18 = vsub.f32 %v556_v40, %v588_v5  ;;  %v176_v21 = vsub.f32 %v570_v49, %v588_v5 }
  0xec   :  { %v185_v9 = vmul.f32 %v169_v6, %v169_v6  ;;  %v186_v10 = vmul.f32 %v170_v7, %v170_v7  ;;  %v187_v13 = vmul.f32 %v171_v8, %v171_v8  ;;  %v188_v16 = vmul.f32 %v172_v11, %v172_v11 }
  0xed   :  { %v189_v19 = vmul.f32 %v173_v12, %v173_v12  ;;  %v190_v22 = vmul.f32 %v174_v15, %v174_v15  ;;  %v177_v24 = vsub.f32 %v546_v35, %v588_v5  ;;  %v191_v25 = vmul.f32 %v175_v18, %v175_v18 }
  0xee   :  { %v201_v14 = vadd.f32 %v186_v10, %v185_v9  ;;  %v178_v27 = vsub.f32 %v554_v39, %v588_v5  ;;  %v192_v28 = vmul.f32 %v176_v21, %v176_v21  ;;  %v179_v30 = vsub.f32 %v567_v47, %v588_v5 }
  0xef   :  { %v193_v31 = vmul.f32 %v177_v24, %v177_v24  ;;  %v180_v42 = vsub.f32 %v578_v55, %v588_v5  ;;  %v181_v48 = vsub.f32 %v552_v38, %v588_v5  ;;  %v182_v52 = vsub.f32 %v564_v45, %v588_v5  ;;  %v238_v24 = vld [vmem:[%s677_s2] sm:$0x1]  ;;  %s502_s2 = smov [#allocation7]  }
  0xf0   :  { %v202_v17 = vadd.f32 %v201_v14, %v187_v13  ;;  %v194_v44 = vmul.f32 %v178_v27, %v178_v27  ;;  %v195_v50 = vmul.f32 %v179_v30, %v179_v30  ;;  %v183_v57 = vsub.f32 %v575_v53, %v588_v5  ;;  %v240_v27 = vld [vmem:[%s678_s3] sm:$0x1]  ;;  %s349_s3 = sshll.u32 %s502_s2, 4  ;;  %s350_s3 = int_to_ptr.vmem [resolvable:$true] %s349_s3 }
  0xf1   :  { %v196_v54 = vmul.f32 %v180_v42, %v180_v42  ;;  %v197_v58 = vmul.f32 %v181_v48, %v181_v48  ;;  %v184_v61 = vsub.f32 %v584_v60, %v588_v5  ;;  %v198_v62 = vmul.f32 %v182_v52, %v182_v52 }
  0xf2   :  { %v203_v20 = vadd.f32 %v202_v17, %v188_v16  ;;  %v199_v0 = vmul.f32 %v183_v57, %v183_v57  ;;  %v222_v10 = vmul.f32 0.0, %v588_v5 }
  0xf3   :  { %v200_v2 = vmul.f32 %v184_v61, %v184_v61 }
  0xf4   :  { %v204_v23 = vadd.f32 %v203_v20, %v189_v19  ;;  %v223_v13 = vmul.f32 %v222_v10, %v588_v5 }
  0xf6   :  { %v205_v26 = vadd.f32 %v204_v23, %v190_v22 }
  0xf8   :  { %v206_v29 = vadd.f32 %v205_v26, %v191_v25 }
  0xfa   :  { %v207_v41 = vadd.f32 %v206_v29, %v192_v28 }
  0xfc   :  { %v208_v46 = vadd.f32 %v207_v41, %v193_v31 }
  0xfe   :  { %v209_v51 = vadd.f32 %v208_v46, %v194_v44 }
 0x100   :  { %v210_v56 = vadd.f32 %v209_v51, %v195_v50 }
 0x102   :  { %v211_v59 = vadd.f32 %v210_v56, %v196_v54 }
 0x104   :  { %v212_v63 = vadd.f32 %v211_v59, %v197_v58 }
 0x106   :  { %v213_v1 = vadd.f32 %v212_v63, %v198_v62 }
 0x108   :  { %v214_v3 = vadd.f32 %v213_v1, %v199_v0 }
 0x10a   :  { %v215_v4 = vadd.f32 %v214_v3, %v200_v2 }
 0x10c   :  { %v216_v6 = vrot.slane %v215_v4, 4 }
 0x10e   :  { %v217_v7 = vadd.f32 %v216_v6, %v215_v4 }
 0x110   :  { %v218_v8 = vrot.slane %v217_v7, 2 }
 0x112   :  { %v219_v9 = vadd.f32 %v218_v8, %v217_v7 }
 0x114   :  { %v220_v11 = vrot.slane %v219_v9, 1 }
 0x116   :  { %v221_v12 = vadd.f32 %v220_v11, %v219_v9 }
 0x118   :  { %v224_v14 = vsub.f32 %v221_v12, %v223_v13 }
 0x11a   :  { %v225_v15 = vmul.f32 0.0078125, %v224_v14 }
 0x11c   :  { %v226_v16 = vmax.f32 %v225_v15, 0.0 }
 0x11e   :  { %v227_v17 = vadd.f32 1e-05, %v226_v16 }
 0x120   :  { %418 = vrsqrt.f32 %v227_v17  ;;  %vm234_vm1 = vweird.f32 %v227_v17 }
 0x126   :  { %v419_v18 = vpop.eup %418 }
 0x127   :  { %v229_v19 = vmul.f32 %v419_v18, %v227_v17  ;;  %vm235_vm0 = vweird.f32 %v419_v18 }
 0x128   :  { %vm236_vm2 = vmor %vm234_vm1, %vm235_vm0 }
 0x129   :  { %v230_v20 = vmul.f32 %v419_v18, %v229_v19 }
 0x12b   :  { %v231_v21 = vmul.f32 0.5, %v230_v20 }
 0x12d   :  { %v232_v22 = vsub.f32 1.5, %v231_v21 }
 0x12f   :  { %v233_v23 = vmul.f32 %v419_v18, %v232_v22 }
 0x131   :  { %v237_v25 = vsel %vm236_vm2, %v419_v18, %v233_v23 }
 0x132   :  { %v239_v26 = vmul.f32 %v238_v24, %v237_v25 }
 0x134   :  { %v241_v28 = vmul.f32 %v239_v26, %v588_v5  ;;  %v244_v29 = vperm.slane %v239_v26, 0 }
 0x136   :  { %v242_v30 = vsub.f32 %v240_v27, %v241_v28  ;;  %v261_v31 = vmul.f32 %v244_v29, %v584_v60  ;;  %v246_v46 = vmul.f32 %v244_v29, %v540_v32  ;;  %v247_v48 = vmul.f32 %v244_v29, %v544_v34 }
 0x137   :  { %v248_v50 = vmul.f32 %v244_v29, %v550_v37  ;;  %v249_v52 = vmul.f32 %v244_v29, %v561_v43  ;;  %v250_v60 = vmul.f32 %v244_v29, %v542_v33  ;;  %v251_v56 = vmul.f32 %v244_v29, %v548_v36 }
 0x138   :  { %v632_v41 = vperm.slane %v242_v30, 0  ;;  %v252_v57 = vmul.f32 %v244_v29, %v556_v40  ;;  %v253_v34 = vmul.f32 %v244_v29, %v570_v49  ;;  %v254_v37 = vmul.f32 %v244_v29, %v546_v35 }
 0x139   :  { %v255_v58 = vmul.f32 %v244_v29, %v554_v39  ;;  %v256_v59 = vmul.f32 %v244_v29, %v567_v47  ;;  %v257_v61 = vmul.f32 %v244_v29, %v578_v55  ;;  %v258_v33 = vmul.f32 %v244_v29, %v552_v38 }
 0x13a   :  { %v280_v42 = vadd.f32 %v632_v41, %v261_v31  ;;  %v265_v5 = vadd.f32 %v632_v41, %v246_v46  ;;  %v266_v54 = vadd.f32 %v632_v41, %v247_v48  ;;  %v267_v32 = vadd.f32 %v632_v41, %v248_v50 }
 0x13b   :  { %v268_v43 = vadd.f32 %v632_v41, %v249_v52  ;;  %v269_v36 = vadd.f32 %v632_v41, %v250_v60  ;;  %v259_v40 = vmul.f32 %v244_v29, %v564_v45  ;;  %v270_v62 = vadd.f32 %v632_v41, %v251_v56 }
 0x13c   :  { %vm296_vm3 = vcmp.ge.f32.partialorder %v280_v42, 0.0  ;;  %v312_v44 = vmul.f32 0.2, %v280_v42  ;;  %vm281_vm4 = vcmp.ge.f32.partialorder %v265_v5, 0.0  ;;  %vm282_vm5 = vcmp.ge.f32.partialorder %v266_v54, 0.0 }
 0x13d   :  { %v271_v35 = vadd.f32 %v632_v41, %v252_v57  ;;  %v297_v49 = vmul.f32 0.2, %v265_v5  ;;  %v298_v39 = vmul.f32 0.2, %v266_v54  ;;  %v299_v63 = vmul.f32 0.2, %v267_v32 }
 0x13e   :  { %v328_v51 = vsel %vm296_vm3, %v280_v42, %v312_v44  ;;  %v260_v0 = vmul.f32 %v244_v29, %v575_v53  ;;  %v272_v47 = vadd.f32 %v632_v41, %v253_v34  ;;  %vm283_vm6 = vcmp.ge.f32.partialorder %v267_v32, 0.0 }
 0x13f   :  { %344 = vst [vmem:[#allocation7 + $0x78] sm:$0xff] %v328_v51  ;;  %v300_v55 = vmul.f32 0.2, %v268_v43  ;;  %v273_v38 = vadd.f32 %v632_v41, %v254_v37  ;;  %vm284_vm7 = vcmp.ge.f32.partialorder %v268_v43, 0.0  ;;  %v301_v1 = vmul.f32 0.2, %v269_v36 }
 0x140   :  { %v313_v45 = vsel %vm281_vm4, %v265_v5, %v297_v49  ;;  %v274_v2 = vadd.f32 %v632_v41, %v255_v58  ;;  %vm285_vm8 = vcmp.ge.f32.partialorder %v269_v36, 0.0  ;;  %v302_v3 = vmul.f32 0.2, %v270_v62 }
 0x141   :  { %v314_v4 = vsel %vm282_vm5, %v266_v54, %v298_v39  ;;  %v275_v6 = vadd.f32 %v632_v41, %v256_v59  ;;  %vm286_vm9 = vcmp.ge.f32.partialorder %v270_v62, 0.0  ;;  %v303_v7 = vmul.f32 0.2, %v271_v35  ;;  %329 = vst [vmem:[#allocation7] sm:$0xff] %v313_v45 }
 0x142   :  { %v315_v53 = vsel %vm283_vm6, %v267_v32, %v299_v63  ;;  %v276_v8 = vadd.f32 %v632_v41, %v257_v61  ;;  %vm287_vm10 = vcmp.ge.f32.partialorder %v271_v35, 0.0  ;;  %v304_v9 = vmul.f32 0.2, %v272_v47  ;;  %330 = vst [vmem:[#allocation7 + $0x8] sm:$0xff] %v314_v4 }
 0x143   :  { %v316_v10 = vsel %vm284_vm7, %v268_v43, %v300_v55  ;;  %v277_v11 = vadd.f32 %v632_v41, %v258_v33  ;;  %vm288_vm11 = vcmp.ge.f32.partialorder %v272_v47, 0.0  ;;  %v305_v12 = vmul.f32 0.2, %v273_v38  ;;  %331 = vst [vmem:[#allocation7 + $0x10] sm:$0xff] %v315_v53 }
 0x144   :  { %v317_v13 = vsel %vm285_vm8, %v269_v36, %v301_v1  ;;  %v278_v14 = vadd.f32 %v632_v41, %v259_v40  ;;  %vm289_vm12 = vcmp.ge.f32.partialorder %v273_v38, 0.0  ;;  %v306_v15 = vmul.f32 0.2, %v274_v2  ;;  %332 = vst [vmem:[#allocation7 + $0x18] sm:$0xff] %v316_v10 }
 0x145   :  { %v318_v16 = vsel %vm286_vm9, %v270_v62, %v302_v3  ;;  %v279_v17 = vadd.f32 %v632_v41, %v260_v0  ;;  %vm290_vm13 = vcmp.ge.f32.partialorder %v274_v2, 0.0  ;;  %v307_v18 = vmul.f32 0.2, %v275_v6  ;;  %333 = vst [vmem:[#allocation7 + $0x20] sm:$0xff] %v317_v13 }
 0x146   :  { %v319_v19 = vsel %vm287_vm10, %v271_v35, %v303_v7  ;;  %vm291_vm14 = vcmp.ge.f32.partialorder %v275_v6, 0.0  ;;  %v308_v20 = vmul.f32 0.2, %v276_v8  ;;  %v320_v21 = vsel %vm288_vm11, %v272_v47, %v304_v9  ;;  %334 = vst [vmem:[#allocation7 + $0x28] sm:$0xff] %v318_v16 }
 0x147   :  { %vm292_vm15 = vcmp.ge.f32.partialorder %v276_v8, 0.0  ;;  %v309_v22 = vmul.f32 0.2, %v277_v11  ;;  %v321_v23 = vsel %vm289_vm12, %v273_v38, %v305_v12  ;;  %vm293_vm0 = vcmp.ge.f32.partialorder %v277_v11, 0.0  ;;  %335 = vst [vmem:[#allocation7 + $0x30] sm:$0xff] %v319_v19 }
 0x148   :  { %v310_v24 = vmul.f32 0.2, %v278_v14  ;;  %v322_v25 = vsel %vm290_vm13, %v274_v2, %v306_v15  ;;  %vm294_vm1 = vcmp.ge.f32.partialorder %v278_v14, 0.0  ;;  %v311_v26 = vmul.f32 0.2, %v279_v17  ;;  %336 = vst [vmem:[#allocation7 + $0x38] sm:$0xff] %v320_v21 }
 0x149   :  { %v323_v27 = vsel %vm291_vm14, %v275_v6, %v307_v18  ;;  %vm295_vm2 = vcmp.ge.f32.partialorder %v279_v17, 0.0  ;;  %v324_v28 = vsel %vm292_vm15, %v276_v8, %v308_v20  ;;  %337 = vst [vmem:[#allocation7 + $0x40] sm:$0xff] %v321_v23  ;;  %v325_v29 = vsel %vm293_vm0, %v277_v11, %v309_v22 }
 0x14a   :  { %338 = vst [vmem:[#allocation7 + $0x48] sm:$0xff] %v322_v25  ;;  %v326_v30 = vsel %vm294_vm1, %v278_v14, %v310_v24  ;;  %v327_v31 = vsel %vm295_vm2, %v279_v17, %v311_v26 }
 0x14b   :  { %339 = vst [vmem:[#allocation7 + $0x50] sm:$0xff] %v323_v27 }
 0x14c   :  { %340 = vst [vmem:[#allocation7 + $0x58] sm:$0xff] %v324_v28 }
 0x14d   :  { %341 = vst [vmem:[#allocation7 + $0x60] sm:$0xff] %v325_v29 }
 0x14e   :  { %342 = vst [vmem:[#allocation7 + $0x68] sm:$0xff] %v326_v30 }
 0x14f   :  { %343 = vst [vmem:[#allocation7 + $0x70] sm:$0xff] %v327_v31 }
 0x150   :  { %357 = dma.vmem_to_hbm [thread:$0]  %s350_s3, 2048, %s352_s5, [#allocation4], %s499_s23, %s499_s23, %s500_s24  }
 0x151   :  { %496 = dma.done.wait [#allocation4], 2048  }
 0x152   :  { %497 = vsyncadd [#allocation4], 4294965248 }
 0x153   :  { %362 = vsyncpa [#allocation3], 1 }
 0x154   :  { %363 = vsyncpa [#allocation6], 1 }
 0x155   :  { %364 = vsyncpa [#allocation4], 1 }

</bundles_post_ra>
